<compile_context>
chip_gen: v7x
topology: tpu7x:2x2x1
jax: 0.10.0
libtpu: 0.0.40
codegen_flags: <defaults>
</compile_context>

<pallas_src>
import math

import jax
import jax.numpy as jnp
from jax.experimental import pallas as pl
from jax.experimental.pallas import tpu as pltpu


def _round_up(a, m):
    return -(-a // m) * m


def _lane_pad(d):
    """Pad a feature width to the next 128-lane multiple (only when misaligned)."""
    return d if d % 128 == 0 else _round_up(d, 128)


def geb_kernel(x_ref, v_ref, wv_ref, wu1x_ref, wu1v_ref, b1_ref, wu2_ref, b2_ref,
               xo_ref, vo_ref):
    """One N-tile of the gated equivariant block (fully fused).

    x_ref : (tn, H)      scalar features              (compute dtype)
    v_ref : (tn, 3*H)    vector features, flattened   (compute dtype)
    wv    : (H, Hp+O)  = [vec1_proj.weight.T, cols padded to Hp | vec2_proj.weight.T]
    wu1x  : (H, I)     = update_net[0].weight.T, x rows
    wu1v  : (Hp, I)    = update_net[0].weight.T, vec1 rows (zero-padded to Hp)
    b1    : (1, I)     f32
    wu2   : (I, Op+O)  = [scalar half of update_net[2].weight.T, padded to Op | gate half]
    b2    : (1, Op+O)  f32
    xo    : (tn, O)    scalar output
    vo    : (tn, 3*O)  gated vector output = [g*q_x | g*q_y | g*q_z]  (lane-dense)
    """
    tn, H = x_ref.shape
    O = xo_ref.shape[-1]
    Hp = wv_ref.shape[-1] - O          # lane-aligned split point between vec1 / vec2
    Op = wu2_ref.shape[-1] - O         # lane-aligned split point between scalar / gate
    cdt = wv_ref.dtype                 # dtype fed to the MXU (f32 or bf16)

    x = x_ref[...]                     # (tn, H)
    wv = wv_ref[...]                   # resident RHS, reused by the three dots below

    # vec1_proj + vec2_proj fused along the output dim; the three spatial components
    # are fed as three dots on lane slices of v (no (3tn, H) stack copy through the
    # single vector-store slot, no extra VMEM buffer).
    def proj(c):
        return jnp.dot(v_ref[:, c * H:(c + 1) * H], wv,
                       preferred_element_type=jnp.float32)

    pr0, pr1, pr2 = proj(0), proj(1), proj(2)
    p0, q0 = pr0[:, :Hp], pr0[:, Hp:]
    p1, q1 = pr1[:, :Hp], pr1[:, Hp:]
    p2, q2 = pr2[:, :Hp], pr2[:, Hp:]

    # L2 norm over the 3-axis in f32 (padded columns stay exactly zero).
    vec1 = jnp.sqrt(p0 * p0 + p1 * p1 + p2 * p2)                 # (tn, Hp)

    # update_net[0]: the [x, vec1] concat folded as two dots sharing the accumulator
    # (no (tn, 2H) temp and no f32<->bf16 round trip of x).
    h = (jnp.dot(x, wu1x_ref[...], preferred_element_type=jnp.float32)
         + jnp.dot(vec1.astype(cdt), wu1v_ref[...], preferred_element_type=jnp.float32)
         + b1_ref[...])
    h = h * jax.nn.sigmoid(h)                                    # SiLU in f32

    # update_net[2]: scalar / gate halves fused along the output dim.
    out2 = jnp.dot(h.astype(cdt), wu2_ref[...],
                   preferred_element_type=jnp.float32) + b2_ref[...]
    xs, vg = out2[:, :O], out2[:, Op:]

    xo_ref[...] = xs.astype(xo_ref.dtype)
    vo_ref[...] = jnp.concatenate([vg * q0, vg * q1, vg * q2],
                                  axis=-1).astype(vo_ref.dtype)


def _vmem_config():
    """Generation-aware VMEM sizing (v5e/v6e: 128 MiB physical, v7x: 64 MiB/core)."""
    cap = None
    try:
        cap = int(pltpu.get_tpu_info().vmem_capacity_bytes)
    except Exception:
        cap = None
    if not cap:
        cap = 64 << 20                                  # assume the tightest (v7x)
    limit = (64 << 20) if cap >= (128 << 20) else (32 << 20)   # scoped limit request
    budget = min(cap // 6, 16 << 20)                    # tiling budget, keeps headroom
    return budget, limit


def _choose_tile(N, H, Hp, O, Op, I, itemsize, vmem_budget, max_tn=512):
    """Pick the N tile: fit the VMEM budget, cap at 512 rows, and keep >= 8 grid steps
    on large problems (>= 4 per TensorCore on v7x) so DMA/compute actually overlap."""
    # TODO(synk): no K/I tiling path — layers whose fused weights alone exceed the
    # scoped VMEM limit would need a reduction-axis grid dimension.
    # Weights/biases (constant index_map): conservatively assume double-buffered.
    w_bytes = 2 * (itemsize * (H * (Hp + O) + H * I + Hp * I + I * (Op + O))
                   + 4 * (I + Op + O))
    # Per-row bytes: double-buffered activation tiles + f32 kernel temporaries.
    row_io = 2 * itemsize * (4 * H + 4 * O)
    row_tmp = 4 * (3 * (Hp + O) + Hp + I + (Op + O) + 3 * O)
    avail = max(vmem_budget - w_bytes, 0)
    tn = avail // max(row_io + row_tmp, 1)
    tn = int(max(8, min(max_tn, tn)))
    tn = (tn // 128) * 128 if tn >= 256 else (tn // 8) * 8
    n8 = _round_up(N, 8)
    tn = min(tn, n8)
    if N >= 8 * 128:                     # big problem: force >= 8 grid steps total
        tn = min(tn, _round_up(pl.cdiv(N, 8), 8))
    return max(8, tn)


def gated_equivariant_block(x, v, params, *, tn=None, compute_dtype=None,
                            single_buffer_weights=False):
    """x: (N, H), v: (N, 3, H) in PyTorch layout.  Returns (x_out (N,O), v_out (N,3,O)).

    compute_dtype: dtype fed to the MXU and used for the outputs.  Pass jnp.bfloat16 on
    the memory-bound v6e/v7x paths even for f32 inputs; keep f32 on v5e.  The 3-axis
    norm, SiLU and all matmul accumulation stay in f32 regardless.
    """
    N, H = x.shape
    assert v.shape == (N, 3, H)
    O = params["w_vec2"].shape[0]
    I = params["w_u1"].shape[0]
    cdt = (jnp.dtype(compute_dtype) if compute_dtype is not None
           else jnp.result_type(x.dtype, v.dtype))

    Hp = _lane_pad(H)     # lane-aligned split point between vec1 / vec2 columns
    Op = _lane_pad(O)     # lane-aligned split point between scalar / gate columns
    f32 = jnp.float32

    # --- parameter plumbing: fold concat/split into fused, lane-aligned weights ---
    wv = jnp.zeros((H, Hp + O), f32)
    wv = wv.at[:, :H].set(params["w_vec1"].T).at[:, Hp:].set(params["w_vec2"].T)
    wu1x = params["w_u1"][:, :H].T.astype(f32)                       # (H, I)
    wu1v = jnp.zeros((Hp, I), f32).at[:H].set(params["w_u1"][:, H:].T)
    wu2 = jnp.zeros((I, Op + O), f32)
    wu2 = wu2.at[:, :O].set(params["w_u2"][:O].T).at[:, Op:].set(params["w_u2"][O:].T)
    b1 = params["b_u1"].reshape(1, I).astype(f32)
    b2 = jnp.zeros((1, Op + O), f32)
    b2 = b2.at[:, :O].set(params["b_u2"][:O]).at[:, Op:].set(params["b_u2"][O:])
    wv = wv.astype(cdt)
    wu1x = wu1x.astype(cdt)
    wu1v = wu1v.astype(cdt)
    wu2 = wu2.astype(cdt)

    # (N, 3, H) -> (N, 3H) is a free row-major reshape: no HBM transpose of v.  Casting
    # to the compute dtype at the boundary halves x/v/output bytes when cdt is bf16.
    x_in = x.astype(cdt)
    v_in = v.reshape(N, 3 * H).astype(cdt)

    vmem_budget, vmem_limit = _vmem_config()
    if tn is None:
        tn = _choose_tile(N, H, Hp, O, Op, I, jnp.dtype(cdt).itemsize, vmem_budget)
    tn = max(8, _round_up(int(tn), 8))

    # Tile-unaligned N: Pallas masks the partial last block (no jnp.pad HBM copy of v).
    grid_n = pl.cdiv(N, tn)

    def act_spec(width):
        return pl.BlockSpec((tn, width), lambda i: (i, 0))

    def const_spec(shape):
        idx = lambda i: (0, 0)
        if single_buffer_weights:
            # v7x: constant-index weights only need one VMEM buffer; halves their
            # footprint when pipeline_mode is supported by the installed JAX.
            try:
                return pl.BlockSpec(shape, idx, pipeline_mode=pl.Buffered(1))
            except Exception:
                pass
        return pl.BlockSpec(shape, idx)

    x_out, v_flat = pl.pallas_call(
        geb_kernel,
        out_shape=(jax.ShapeDtypeStruct((N, O), cdt),
                   jax.ShapeDtypeStruct((N, 3 * O), cdt)),
        grid=(grid_n,),
        in_specs=[
            act_spec(H),                 # x
            act_spec(3 * H),             # v, spatial components flattened
            const_spec((H, Hp + O)),     # fused vec1/vec2 projection weight
            const_spec((H, I)),          # update_net[0] weight, x rows
            const_spec((Hp, I)),         # update_net[0] weight, vec1 rows
            const_spec((1, I)),          # update_net[0] bias
            const_spec((I, Op + O)),     # update_net[2] weight (scalar | gate)
            const_spec((1, Op + O)),     # update_net[2] bias
        ],
        out_specs=(act_spec(O), act_spec(3 * O)),
        compiler_params=pltpu.CompilerParams(
            dimension_semantics=("parallel",),
            vmem_limit_bytes=vmem_limit,
        ),
    )(x_in, v_in, wv, wu1x, wu1v, b1, wu2, b2)

    return x_out, v_flat.reshape(N, 3, O)     # free row-major reshape; no slab split


def xavier_uniform(key, shape):
    # torch Linear weight layout: (fan_out, fan_in)
    fan_out, fan_in = shape
    limit = math.sqrt(6.0 / (fan_in + fan_out))
    return jax.random.uniform(key, shape, jnp.float32, -limit, limit)


def make_params(key, hidden, out, intermediate):
    k1, k2, k3, k4 = jax.random.split(key, 4)
    return {
        "w_vec1": xavier_uniform(k1, (hidden, hidden)),           # vec1_proj.weight
        "w_vec2": xavier_uniform(k2, (out, hidden)),               # vec2_proj.weight
        "w_u1": xavier_uniform(k3, (intermediate, 2 * hidden)),    # update_net[0].weight
        "b_u1": jnp.zeros((intermediate,), jnp.float32),
        "w_u2": xavier_uniform(k4, (2 * out, intermediate)),       # update_net[2].weight
        "b_u2": jnp.zeros((2 * out,), jnp.float32),
    }


def reference(x, v, params, out_channels):
    hp = jax.lax.Precision.HIGHEST
    vec1p = jnp.einsum("nch,oh->nco", v, params["w_vec1"], precision=hp)
    vec1 = jnp.sqrt(jnp.sum(vec1p * vec1p, axis=-2))
    vec2 = jnp.einsum("nch,oh->nco", v, params["w_vec2"], precision=hp)
    xc = jnp.concatenate([x, vec1], axis=-1)
    h = jnp.dot(xc, params["w_u1"].T, precision=hp) + params["b_u1"]
    h = h * jax.nn.sigmoid(h)
    o = jnp.dot(h, params["w_u2"].T, precision=hp) + params["b_u2"]
    xo, vgate = o[:, :out_channels], o[:, out_channels:]
    return xo, vgate[:, None, :] * vec2


if __name__ == "__main__":
    N, H, O = 16, 32, 16      # nodes, hidden_channels, out_channels
    I = H                     # intermediate_channels defaults to hidden_channels

    key = jax.random.PRNGKey(0)
    kx, kv, kp = jax.random.split(key, 3)
    x = jax.random.normal(kx, (N, H), jnp.float32)
    v = jax.random.normal(kv, (N, 3, H), jnp.float32)
    params = make_params(kp, H, O, I)
    x_exp, v_exp = reference(x, v, params, O)

    # f32 feed, auto-chosen tile
    x_out, v_out = gated_equivariant_block(x, v, params)
    jax.block_until_ready((x_out, v_out))
    assert x_out.shape == (N, O) and v_out.shape == (N, 3, O)
    assert jnp.allclose(x_out.astype(jnp.float32), x_exp, atol=5e-4, rtol=5e-4)
    assert jnp.allclose(v_out.astype(jnp.float32), v_exp, atol=5e-4, rtol=5e-4)

    # N not a multiple of the tile: exercises the masked partial-last-block path
    # (grid of 3 tiles of 8 rows; no jnp.pad copy of v).
    N2 = 20
    x2 = jax.random.normal(kx, (N2, H), jnp.float32)
    v2 = jax.random.normal(kv, (N2, 3, H), jnp.float32)
    x2_exp, v2_exp = reference(x2, v2, params, O)
    x2_out, v2_out = gated_equivariant_block(x2, v2, params, tn=8)
    jax.block_until_ready((x2_out, v2_out))
    assert x2_out.shape == (N2, O) and v2_out.shape == (N2, 3, O)
    assert jnp.allclose(x2_out.astype(jnp.float32), x2_exp, atol=5e-4, rtol=5e-4)
    assert jnp.allclose(v2_out.astype(jnp.float32), v2_exp, atol=5e-4, rtol=5e-4)

    # bf16 MXU feed from f32 inputs (v6e/v7x bandwidth mode): accumulation stays f32
    xb_out, vb_out = gated_equivariant_block(x, v, params, compute_dtype=jnp.bfloat16)
    jax.block_until_ready((xb_out, vb_out))
    xb = xb_out.astype(jnp.float32)
    vb = vb_out.astype(jnp.float32)
    assert jnp.all(jnp.isfinite(xb)) and jnp.all(jnp.isfinite(vb))
    assert jnp.allclose(xb, x_exp, atol=2e-1, rtol=2e-1)
    assert jnp.allclose(vb, v_exp, atol=2e-1, rtol=2e-1)

    print("KERNEL_OK")
</pallas_src>

<mosaic_0001>
module attributes {stable_mosaic.version = 11 : i64} {
  func.func @geb_kernel(%arg0: i32, %arg1: memref<16x32xf32, #tpu.memory_space<vmem>>, %arg2: memref<16x96xf32, #tpu.memory_space<vmem>>, %arg3: memref<32x144xf32, #tpu.memory_space<vmem>>, %arg4: memref<32x32xf32, #tpu.memory_space<vmem>>, %arg5: memref<128x32xf32, #tpu.memory_space<vmem>>, %arg6: memref<1x32xf32, #tpu.memory_space<vmem>>, %arg7: memref<32x144xf32, #tpu.memory_space<vmem>>, %arg8: memref<1x144xf32, #tpu.memory_space<vmem>>, %arg9: memref<16x16xf32, #tpu.memory_space<vmem>>, %arg10: memref<16x48xf32, #tpu.memory_space<vmem>>) attributes {dimension_semantics = [#tpu.dimension_semantics<parallel>], iteration_bounds = array<i64: 1>, scalar_prefetch = 0 : i64, scratch_operands = 0 : i64, tpu.core_type = #tpu.core_type<tc>, window_params = [{transform_indices = @transform_0, window_bounds = array<i64: 16, 32>}, {transform_indices = @transform_1, window_bounds = array<i64: 16, 96>}, {pipeline_mode = #tpu.pipeline_mode<synchronous>, transform_indices = @transform_2, window_bounds = array<i64: 32, 144>}, {pipeline_mode = #tpu.pipeline_mode<synchronous>, transform_indices = @transform_3, window_bounds = array<i64: 32, 32>}, {pipeline_mode = #tpu.pipeline_mode<synchronous>, transform_indices = @transform_4, window_bounds = array<i64: 128, 32>}, {pipeline_mode = #tpu.pipeline_mode<synchronous>, transform_indices = @transform_5, window_bounds = array<i64: 1, 32>}, {pipeline_mode = #tpu.pipeline_mode<synchronous>, transform_indices = @transform_6, window_bounds = array<i64: 32, 144>}, {pipeline_mode = #tpu.pipeline_mode<synchronous>, transform_indices = @transform_7, window_bounds = array<i64: 1, 144>}, {transform_indices = @transform_8, window_bounds = array<i64: 16, 16>}, {transform_indices = @transform_9, window_bounds = array<i64: 16, 48>}]} {
    %c0 = arith.constant 0 : index
    %c0_0 = arith.constant 0 : index
    %0 = vector.load %arg1[%c0, %c0_0] : memref<16x32xf32, #tpu.memory_space<vmem>>, vector<16x32xf32>
    %c0_1 = arith.constant 0 : index
    %c0_2 = arith.constant 0 : index
    %1 = vector.load %arg3[%c0_1, %c0_2] : memref<32x144xf32, #tpu.memory_space<vmem>>, vector<32x144xf32>
    %c0_3 = arith.constant 0 : index
    %c0_4 = arith.constant 0 : index
    %2 = vector.load %arg2[%c0_3, %c0_4] : memref<16x96xf32, #tpu.memory_space<vmem>>, vector<16x32xf32>
    %cst = arith.constant dense<0.000000e+00> : vector<16x144xf32>
    %3 = tpu.matmul %2, %1, %cst {dimension_numbers = #tpu.dot_dimension_numbers<[1], [0], [0], [1], [0, 0, 1, 1], [], []>} : vector<16x32xf32>, vector<32x144xf32>, vector<16x144xf32> -> vector<16x144xf32>
    %c0_5 = arith.constant 0 : index
    %c32 = arith.constant 32 : index
    %4 = vector.load %arg2[%c0_5, %c32] : memref<16x96xf32, #tpu.memory_space<vmem>>, vector<16x32xf32>
    %cst_6 = arith.constant dense<0.000000e+00> : vector<16x144xf32>
    %5 = tpu.matmul %4, %1, %cst_6 {dimension_numbers = #tpu.dot_dimension_numbers<[1], [0], [0], [1], [0, 0, 1, 1], [], []>} : vector<16x32xf32>, vector<32x144xf32>, vector<16x144xf32> -> vector<16x144xf32>
    %c0_7 = arith.constant 0 : index
    %c64 = arith.constant 64 : index
    %6 = vector.load %arg2[%c0_7, %c64] : memref<16x96xf32, #tpu.memory_space<vmem>>, vector<16x32xf32>
    %cst_8 = arith.constant dense<0.000000e+00> : vector<16x144xf32>
    %7 = tpu.matmul %6, %1, %cst_8 {dimension_numbers = #tpu.dot_dimension_numbers<[1], [0], [0], [1], [0, 0, 1, 1], [], []>} : vector<16x32xf32>, vector<32x144xf32>, vector<16x144xf32> -> vector<16x144xf32>
    %8 = vector.extract_strided_slice %3 {offsets = [0, 0], sizes = [16, 128], strides = [1, 1]} : vector<16x144xf32> to vector<16x128xf32>
    %9 = vector.extract_strided_slice %3 {offsets = [0, 128], sizes = [16, 16], strides = [1, 1]} : vector<16x144xf32> to vector<16x16xf32>
    %10 = vector.extract_strided_slice %5 {offsets = [0, 0], sizes = [16, 128], strides = [1, 1]} : vector<16x144xf32> to vector<16x128xf32>
    %11 = vector.extract_strided_slice %5 {offsets = [0, 128], sizes = [16, 16], strides = [1, 1]} : vector<16x144xf32> to vector<16x16xf32>
    %12 = vector.extract_strided_slice %7 {offsets = [0, 0], sizes = [16, 128], strides = [1, 1]} : vector<16x144xf32> to vector<16x128xf32>
    %13 = vector.extract_strided_slice %7 {offsets = [0, 128], sizes = [16, 16], strides = [1, 1]} : vector<16x144xf32> to vector<16x16xf32>
    %14 = arith.mulf %8, %8 : vector<16x128xf32>
    %15 = arith.mulf %10, %10 : vector<16x128xf32>
    %16 = arith.addf %14, %15 : vector<16x128xf32>
    %17 = arith.mulf %12, %12 : vector<16x128xf32>
    %18 = arith.addf %16, %17 : vector<16x128xf32>
    %19 = math.sqrt %18 : vector<16x128xf32>
    %c0_9 = arith.constant 0 : index
    %c0_10 = arith.constant 0 : index
    %20 = vector.load %arg4[%c0_9, %c0_10] : memref<32x32xf32, #tpu.memory_space<vmem>>, vector<32x32xf32>
    %cst_11 = arith.constant dense<0.000000e+00> : vector<16x32xf32>
    %21 = tpu.matmul %0, %20, %cst_11 {dimension_numbers = #tpu.dot_dimension_numbers<[1], [0], [0], [1], [0, 0, 1, 1], [], []>} : vector<16x32xf32>, vector<32x32xf32>, vector<16x32xf32> -> vector<16x32xf32>
    %c0_12 = arith.constant 0 : index
    %c0_13 = arith.constant 0 : index
    %22 = vector.load %arg5[%c0_12, %c0_13] : memref<128x32xf32, #tpu.memory_space<vmem>>, vector<128x32xf32>
    %cst_14 = arith.constant dense<0.000000e+00> : vector<16x32xf32>
    %23 = tpu.matmul %19, %22, %cst_14 {dimension_numbers = #tpu.dot_dimension_numbers<[1], [0], [0], [1], [0, 0, 1, 1], [], []>} : vector<16x128xf32>, vector<128x32xf32>, vector<16x32xf32> -> vector<16x32xf32>
    %24 = arith.addf %21, %23 : vector<16x32xf32>
    %c0_15 = arith.constant 0 : index
    %c0_16 = arith.constant 0 : index
    %25 = vector.load %arg6[%c0_15, %c0_16] : memref<1x32xf32, #tpu.memory_space<vmem>>, vector<1x32xf32>
    %26 = vector.broadcast %25 : vector<1x32xf32> to vector<16x32xf32>
    %27 = arith.addf %24, %26 : vector<16x32xf32>
    %28 = arith.negf %27 : vector<16x32xf32>
    %29 = math.exp %28 : vector<16x32xf32>
    %cst_17 = arith.constant 1.000000e+00 : f32
    %30 = vector.broadcast %cst_17 : f32 to vector<16x32xf32>
    %31 = arith.addf %30, %29 : vector<16x32xf32>
    %32 = arith.divf %30, %31 : vector<16x32xf32>
    %33 = arith.mulf %27, %32 : vector<16x32xf32>
    %c0_18 = arith.constant 0 : index
    %c0_19 = arith.constant 0 : index
    %34 = vector.load %arg7[%c0_18, %c0_19] : memref<32x144xf32, #tpu.memory_space<vmem>>, vector<32x144xf32>
    %cst_20 = arith.constant dense<0.000000e+00> : vector<16x144xf32>
    %35 = tpu.matmul %33, %34, %cst_20 {dimension_numbers = #tpu.dot_dimension_numbers<[1], [0], [0], [1], [0, 0, 1, 1], [], []>} : vector<16x32xf32>, vector<32x144xf32>, vector<16x144xf32> -> vector<16x144xf32>
    %c0_21 = arith.constant 0 : index
    %c0_22 = arith.constant 0 : index
    %36 = vector.load %arg8[%c0_21, %c0_22] : memref<1x144xf32, #tpu.memory_space<vmem>>, vector<1x144xf32>
    %37 = vector.broadcast %36 : vector<1x144xf32> to vector<16x144xf32>
    %38 = arith.addf %35, %37 : vector<16x144xf32>
    %39 = vector.extract_strided_slice %38 {offsets = [0, 0], sizes = [16, 16], strides = [1, 1]} : vector<16x144xf32> to vector<16x16xf32>
    %40 = vector.extract_strided_slice %38 {offsets = [0, 128], sizes = [16, 16], strides = [1, 1]} : vector<16x144xf32> to vector<16x16xf32>
    %c0_23 = arith.constant 0 : index
    %c0_24 = arith.constant 0 : index
    %41 = vector.load %arg9[%c0_23, %c0_24] : memref<16x16xf32, #tpu.memory_space<vmem>>, vector<16x16xf32>
    tpu.vector_store %arg9[%c0_23, %c0_24], %39 {strides = array<i32>} : memref<16x16xf32, #tpu.memory_space<vmem>>, vector<16x16xf32>,
    %42 = arith.mulf %40, %9 : vector<16x16xf32>
    %43 = arith.mulf %40, %11 : vector<16x16xf32>
    %44 = arith.mulf %40, %13 : vector<16x16xf32>
    %45 = tpu.concatenate %42, %43, %44 in 1 : vector<16x16xf32>, vector<16x16xf32>, vector<16x16xf32> -> vector<16x48xf32>
    %c0_25 = arith.constant 0 : index
    %c0_26 = arith.constant 0 : index
    %46 = vector.load %arg10[%c0_25, %c0_26] : memref<16x48xf32, #tpu.memory_space<vmem>>, vector<16x48xf32>
    tpu.vector_store %arg10[%c0_25, %c0_26], %45 {strides = array<i32>} : memref<16x48xf32, #tpu.memory_space<vmem>>, vector<16x48xf32>,
    return
  }
  func.func @transform_0(%arg0: i32) -> (i32, i32) {
    %c0_i32 = arith.constant 0 : i32
    %c0_i32_0 = arith.constant 0 : i32
    return %arg0, %c0_i32 : i32, i32
  }
  func.func @transform_1(%arg0: i32) -> (i32, i32) {
    %c0_i32 = arith.constant 0 : i32
    %c0_i32_0 = arith.constant 0 : i32
    return %arg0, %c0_i32 : i32, i32
  }
  func.func @transform_2(%arg0: i32) -> (i32, i32) {
    %c0_i32 = arith.constant 0 : i32
    %c0_i32_0 = arith.constant 0 : i32
    %c0_i32_1 = arith.constant 0 : i32
    return %c0_i32, %c0_i32_0 : i32, i32
  }
  func.func @transform_3(%arg0: i32) -> (i32, i32) {
    %c0_i32 = arith.constant 0 : i32
    %c0_i32_0 = arith.constant 0 : i32
    %c0_i32_1 = arith.constant 0 : i32
    return %c0_i32, %c0_i32_0 : i32, i32
  }
  func.func @transform_4(%arg0: i32) -> (i32, i32) {
    %c0_i32 = arith.constant 0 : i32
    %c0_i32_0 = arith.constant 0 : i32
    %c0_i32_1 = arith.constant 0 : i32
    return %c0_i32, %c0_i32_0 : i32, i32
  }
  func.func @transform_5(%arg0: i32) -> (i32, i32) {
    %c0_i32 = arith.constant 0 : i32
    %c0_i32_0 = arith.constant 0 : i32
    %c0_i32_1 = arith.constant 0 : i32
    return %c0_i32, %c0_i32_0 : i32, i32
  }
  func.func @transform_6(%arg0: i32) -> (i32, i32) {
    %c0_i32 = arith.constant 0 : i32
    %c0_i32_0 = arith.constant 0 : i32
    %c0_i32_1 = arith.constant 0 : i32
    return %c0_i32, %c0_i32_0 : i32, i32
  }
  func.func @transform_7(%arg0: i32) -> (i32, i32) {
    %c0_i32 = arith.constant 0 : i32
    %c0_i32_0 = arith.constant 0 : i32
    %c0_i32_1 = arith.constant 0 : i32
    return %c0_i32, %c0_i32_0 : i32, i32
  }
  func.func @transform_8(%arg0: i32) -> (i32, i32) {
    %c0_i32 = arith.constant 0 : i32
    %c0_i32_0 = arith.constant 0 : i32
    return %arg0, %c0_i32 : i32, i32
  }
  func.func @transform_9(%arg0: i32) -> (i32, i32) {
    %c0_i32 = arith.constant 0 : i32
    %c0_i32_0 = arith.constant 0 : i32
    return %arg0, %c0_i32 : i32, i32
  }
}

</mosaic_0001>

<bundles_post_ra>
// kernel: tpu_custom_call.1
= control target key start
LH: loop header
LB: loop body
LE: loop exit
PB: predicated region body
PF: predicated region fallthrough
CT: control target
= control target key end

     0   :  { %15 = vsyncpa [#allocation3], 0  ;;  %s1272_s0 = inlined_call_operand.hbm [shape: f32[16,32], index: 0, kind: input, shape index: {}]   ;;  %s1273_s1 = inlined_call_operand.hbm [shape: f32[16,96], index: 1, kind: input, shape index: {}]   ;;  %s1274_s2 = inlined_call_operand.vmem [shape: f32[32,144], index: 2, kind: input, shape index: {}]   ;;  %s1275_s3 = inlined_call_operand.vmem [shape: f32[32,32], index: 3, kind: input, shape index: {}]   ;;  %s1276_s4 = inlined_call_operand.vmem [shape: f32[128,32], index: 4, kind: input, shape index: {}]   ;;  %s1277_s5 = inlined_call_operand.vmem [shape: f32[1,32], index: 5, kind: input, shape index: {}]   ;;  %s1278_s6 = inlined_call_operand.vmem [shape: f32[32,144], index: 6, kind: input, shape index: {}]   ;;  %s1279_s7 = inlined_call_operand.vmem [shape: f32[1,144], index: 7, kind: input, shape index: {}]   ;;  %s1280_s8 = inlined_call_operand.hbm [shape: f32[16,16], index: 8, kind: output, shape index: {0}]   ;;  %s1281_s9 = inlined_call_operand.hbm [shape: f32[16,48], index: 9, kind: output, shape index: {1}]  }
   0x1   :  { %16 = vsyncpa [#allocation6], 0 }
   0x2   :  { %17 = vsyncpa [#allocation4], 0 }
   0x3   :  { %18 = vsyncpa [#allocation9], 0  ;;  %s995_s30 = smov [#allocation2]   ;;  %s899_s13 = scalar_lea.hbm %s1272_s0, 256 }
   0x4   :  { %s24_s10 = sshll.u32 %s995_s30, 4  ;;  %p900_p0 = scmp.ne.s32.totalorder %s1272_s0, %s899_s13  ;;  %s25_s10 = int_to_ptr.vmem [resolvable:$true] %s24_s10 }
   0x5   :  { %p903_p1 = scmp.lt.u32.totalorder %s899_s13, %s1272_s0 }
   0x7   :  { %p905_p2 = pnand %p903_p1, %p900_p0 }
   0x9   :  { %908 = shalt.err (!%p905_p2)
}
   0xa   :  { %s909_s18 = scalar_lea.vmem %s25_s10, 256  ;;  %p914_p4 = scmp.lt.s32.totalorder %s25_s10, %s25_s10 }
   0xb   :  { %p910_p3 = scmp.ne.s32.totalorder %s25_s10, %s909_s18  ;;  %p915_p5 = scmp.lt.s32.totalorder %s909_s18, %s909_s18 }
   0xd   :  { %p916_p6 = por %p915_p5, %p914_p4 }
   0xf   :  { %p917_p7 = pnand %p916_p6, %p910_p3 }
  0x11   :  { %920 = shalt.err (!%p917_p7)
}
  0x12   :  { %s996_s19 = smov 128   ;;  %s997_s20 = smov 8  }
  0x13   :  { %30 = dma.hbm_to_vmem [thread:$0]  %s1272_s0, 256, %s25_s10, [#allocation3], %s996_s19, %s996_s19, %s997_s20  }
  0x14   :  { %s998_s23 = smov [#allocation5]   ;;  %s921_s27 = scalar_lea.hbm %s1273_s1, 256 }
  0x15   :  { %s36_s24 = sshll.u32 %s998_s23, 4  ;;  %p922_p8 = scmp.ne.s32.totalorder %s1273_s1, %s921_s27  ;;  %s37_s24 = int_to_ptr.vmem [resolvable:$true] %s36_s24 }
  0x16   :  { %p925_p9 = scmp.lt.u32.totalorder %s921_s27, %s1273_s1 }
  0x18   :  { %p927_p10 = pnand %p925_p9, %p922_p8 }
  0x1a   :  { %930 = shalt.err (!%p927_p10)
}
  0x1b   :  { %s931_s12 = scalar_lea.vmem %s37_s24, 256  ;;  %p936_p12 = scmp.lt.s32.totalorder %s37_s24, %s37_s24 }
  0x1c   :  { %p932_p11 = scmp.ne.s32.totalorder %s37_s24, %s931_s12  ;;  %p937_p13 = scmp.lt.s32.totalorder %s931_s12, %s931_s12 }
  0x1e   :  { %p938_p0 = por %p937_p13, %p936_p12 }
  0x20   :  { %p939_p1 = pnand %p938_p0, %p932_p11 }
  0x22   :  { %942 = shalt.err (!%p939_p1)
}
  0x23   :  { %42 = dma.hbm_to_vmem [thread:$0]  %s1273_s1, 256, %s37_s24, [#allocation6], %s996_s19, %s996_s19, %s997_s20  }
  0x24   :  { %987 = dma.done.wait [#allocation3], 256  }
  0x25   :  { %988 = vsyncadd [#allocation3], 4294967040 }
  0x26   :  { %989 = dma.done.wait [#allocation6], 256  }
  0x27   :  { %990 = vsyncadd [#allocation6], 4294967040  ;;  %v999_v0 = vmov 0.0   ;;  %v71_v1 = vld [vmem:[#allocation5] sm:$0xff]  ;;  %v64_v2 = vld [vmem:[%s1274_s2 + $0x8] sm:$0xff]  ;;  %s1000_s15 = smov 96  }
  0x28   :  { %144 = vmatprep.mubr.f32.mxu0 %v999_v0  ;;  %157 = vrot.lane.b32.xlu0 %v71_v1, %s1000_s15  ;;  %v72_v3 = vld [vmem:[#allocation5 + $0x8] sm:$0xff]  ;;  %s1001_s16 = smov 64   ;;  %v63_v5 = vld [vmem:[%s1274_s2] sm:$0xff]  ;;  %v65_v7 = vld [vmem:[%s1274_s2 + $0x10] sm:$0xff]  ;;  %vm73_vm0 = vcmask 261120   ;;  %vm653_vm5 = vcmask 130048  }
  0x29   :  { %242 = vrot.lane.b32.xlu1 %v71_v1, %s1001_s16  ;;  %v66_v4 = vld [vmem:[%s1274_s2 + $0x18] sm:$0xff]  ;;  %v68_v8 = vld [vmem:[%s1274_s2 + $0x28] sm:$0xff]  ;;  %v804_v10 = vpack.c.bf16 %v65_v7, %v63_v5  ;;  %v67_v12 = vld [vmem:[%s1274_s2 + $0x20] sm:$0xff]  ;;  %s1002_s22 = smov [#allocation7]  }
  0x2a   :  { %v802_v6 = vpack.c.bf16 %v66_v4, %v64_v2  ;;  %v70_v9 = vld [vmem:[%s1274_s2 + $0x38] sm:$0xff]  ;;  %v69_v13 = vld [vmem:[%s1274_s2 + $0x30] sm:$0xff]  ;;  %v355_v15 = vld [vmem:[%s1276_s4] sm:$0xff]  ;;  %s690_s23 = sshll.u32 %s1002_s22, 4  ;;  %s691_s23 = int_to_ptr.vmem [resolvable:$true] %s690_s23 }
  0x2b   :  { %v806_v11 = vpack.c.bf16 %v70_v9, %v68_v8  ;;  %v808_v14 = vpack.c.bf16 %v69_v13, %v67_v12  ;;  %v356_v16 = vld [vmem:[%s1276_s4 + $0x8] sm:$0xff]  ;;  %v357_v22 = vld [vmem:[%s1276_s4 + $0x10] sm:$0xff]  ;;  %v358_v23 = vld [vmem:[%s1276_s4 + $0x18] sm:$0xff]  ;;  %p948_p3 = scmp.lt.s32.totalorder %s691_s23, %s691_s23 }
  0x2c   :  { %803 = vmatprep.subr.bf16.mxu0 %v802_v6  ;;  %159 = vrot.lane.b32.xlu0 %v72_v3, %s1000_s15  ;;  %v826_v17 = vpack.c.bf16 %v356_v16, %v355_v15  ;;  %v830_v24 = vpack.c.bf16 %v358_v23, %v357_v22  ;;  %v359_v25 = vld [vmem:[%s1276_s4 + $0x20] sm:$0xff]  ;;  %v360_v26 = vld [vmem:[%s1276_s4 + $0x28] sm:$0xff]  ;;  %v361_v28 = vld [vmem:[%s1276_s4 + $0x30] sm:$0xff] }
  0x2d   :  { %244 = vrot.lane.b32.xlu1 %v72_v3, %s1001_s16  ;;  %805 = vmatpush1.bf16.msra.mxu0 %v804_v10  ;;  %v834_v27 = vpack.c.bf16 %v360_v26, %v359_v25  ;;  %v362_v29 = vld [vmem:[%s1276_s4 + $0x38] sm:$0xff]  ;;  %v363_v31 = vld [vmem:[%s1276_s4 + $0x40] sm:$0xff]  ;;  %v364_v32 = vld [vmem:[%s1276_s4 + $0x48] sm:$0xff] }
  0x2e   :  { %807 = vmatprep.subr.bf16.mxu0 %v806_v11  ;;  %827 = vmatprep.subr.bf16.mxu1 %v826_v17  ;;  %v838_v30 = vpack.c.bf16 %v362_v29, %v361_v28  ;;  %v842_v33 = vpack.c.bf16 %v364_v32, %v363_v31  ;;  %v365_v34 = vld [vmem:[%s1276_s4 + $0x50] sm:$0xff]  ;;  %v366_v35 = vld [vmem:[%s1276_s4 + $0x58] sm:$0xff]  ;;  %v367_v36 = vld [vmem:[%s1276_s4 + $0x60] sm:$0xff] }
  0x2f   :  { %829 = vmatpush3.bf16.msra.mxu1 %v826_v17  ;;  %v846_v37 = vpack.c.bf16 %v366_v35, %v365_v34  ;;  %v368_v38 = vld [vmem:[%s1276_s4 + $0x68] sm:$0xff]  ;;  %v369_v40 = vld [vmem:[%s1276_s4 + $0x70] sm:$0xff]  ;;  %v370_v41 = vld [vmem:[%s1276_s4 + $0x78] sm:$0xff]  ;;  %s943_s4 = scalar_lea.vmem %s691_s23, 256 }
  0x30   :  { %831 = vmatprep.subr.bf16.mxu1 %v830_v24  ;;  %v850_v39 = vpack.c.bf16 %v368_v38, %v367_v36  ;;  %v854_v42 = vpack.c.bf16 %v370_v41, %v369_v40  ;;  %v351_v45 = vld [vmem:[%s1275_s3] sm:$0xff]  ;;  %v352_v46 = vld [vmem:[%s1275_s3 + $0x8] sm:$0xff]  ;;  %v354_v12 = vld [vmem:[%s1275_s3 + $0x18] sm:$0xff]  ;;  %p944_p2 = scmp.ne.s32.totalorder %s691_s23, %s943_s4  ;;  %p949_p4 = scmp.lt.s32.totalorder %s943_s4, %s943_s4 }
  0x31   :  { %809 = vmatpush1.bf16.msra.mxu0 %v808_v14  ;;  %v858_v48 = vpack.c.bf16 %v352_v46, %v351_v45  ;;  %v61_v17 = vld [vmem:[#allocation2] sm:$0xff]  ;;  %v555_v26 = vld [vmem:[%s1278_s6 + $0x28] sm:$0xff] }
  0x32   :  { %811 = vmatprep.subr.bf16.mxu0 %v802_v6  ;;  %v550_v23 = vld [vmem:[%s1278_s6] sm:$0xff]  ;;  %p950_p5 = por %p949_p4, %p948_p3 }
  0x33   :  { %833 = vmatpush3.bf16.msra.mxu1 %v830_v24  ;;  %v552_v24 = vld [vmem:[%s1278_s6 + $0x10] sm:$0xff]  ;;  %v554_v29 = vld [vmem:[%s1278_s6 + $0x20] sm:$0xff] }
  0x34   :  { %719 = vmatmul.mubr.msk.f32.vlgmr.msra.gmra.mrb[0].mxu0 %vm73_vm0, %v71_v1  ;;  %835 = vmatprep.subr.bf16.mxu1 %v834_v27  ;;  %v868_v25 = vpack.c.bf16 %v552_v24, %v550_v23  ;;  %v727_v32 = vld [vmem:[%s1277_s5] ss:$0 sm:$0xff]  ;;  %p951_p6 = pnand %p950_p5, %p944_p2 }
  0x35   :  { %813 = vmatpush1.bf16.msra.mxu0 %v804_v10  ;;  %150 = vmatprep.mubr.f32.mxu0 %v999_v0 }
  0x36   :  { %815 = vmatprep.subr.bf16.mxu0 %v806_v11 }
  0x37   :  { %837 = vmatpush3.bf16.msra.mxu1 %v834_v27  ;;  %v557_v27 = vld [vmem:[%s1278_s6 + $0x38] sm:$0xff] }
  0x38   :  { %720 = vmatmul.mubr.msk.f32.gmra.mrb[2].mxu0 %vm73_vm0, %v72_v3  ;;  %839 = vmatprep.subr.bf16.mxu1 %v838_v30  ;;  %v870_v28 = vpack.c.bf16 %v557_v27, %v555_v26 }
  0x39   :  { %817 = vmatpush1.bf16.msra.mxu0 %v808_v14  ;;  %229 = vmatprep.mubr.f32.mxu0 %v999_v0 }
  0x3a   :  { %819 = vmatprep.subr.bf16.mxu0 %v802_v6 }
  0x3b   :  { %841 = vmatpush3.bf16.msra.mxu1 %v838_v30  ;;  %v556_v30 = vld [vmem:[%s1278_s6 + $0x30] sm:$0xff] }
  0x3c   :  { %843 = vmatprep.subr.bf16.mxu1 %v842_v33  ;;  %v872_v31 = vpack.c.bf16 %v556_v30, %v554_v29 }
  0x3f   :  { %845 = vmatpush3.bf16.msra.mxu1 %v842_v33 }
  0x40   :  { %847 = vmatprep.subr.bf16.mxu1 %v846_v37 }
  0x43   :  { %849 = vmatpush3.bf16.msra.mxu1 %v846_v37 }
  0x44   :  { %851 = vmatprep.subr.bf16.mxu1 %v850_v39 }
  0x47   :  { %853 = vmatpush3.bf16.msra.mxu1 %v850_v39 }
  0x48   :  { %855 = vmatprep.subr.bf16.mxu1 %v854_v42 }
  0x4b   :  { %857 = vmatpush3.bf16.msra.mxu1 %v854_v42 }
  0x4c   :  { %859 = vmatprep.subr.bf16.mxu1 %v858_v48 }
  0x9a   :  { %v158_v18 = vpop.permute.xlu0 %157 }
  0x9b   :  { %721 = vmatmul.mubr.msk.f32.vlgmr.msra.gmra.mrb[4].mxu0 %vm73_vm0, %v158_v18  ;;  %v243_v20 = vpop.permute.xlu1 %242 }
  0x9c   :  { %821 = vmatpush1.bf16.msra.mxu0 %v804_v10  ;;  %235 = vmatprep.mubr.f32.mxu0 %v999_v0 }
  0x9d   :  { %823 = vmatprep.subr.bf16.mxu0 %v806_v11  ;;  %v353_v11 = vld [vmem:[%s1275_s3 + $0x10] sm:$0xff] }
  0x9e   :  { %v160_v19 = vpop.permute.xlu0 %159  ;;  %v862_v16 = vpack.c.bf16 %v354_v12, %v353_v11 }
  0x9f   :  { %722 = vmatmul.mubr.msk.f32.gmra.mrb[6].mxu0 %vm73_vm0, %v160_v19  ;;  %v245_v21 = vpop.permute.xlu1 %244  ;;  %v62_v19 = vld [vmem:[#allocation2 + $0x8] sm:$0xff] }
  0xa0   :  { %825 = vmatpush1.bf16.msra.mxu0 %v808_v14  ;;  %314 = vmatprep.mubr.f32.mxu0 %v999_v0 }
  0xa3   :  { %723 = vmatmul.mubr.msk.f32.vlgmr.msra.gmra.mrb[8].mxu0 %vm73_vm0, %v243_v20  ;;  %v551_v20 = vld [vmem:[%s1278_s6 + $0x8] sm:$0xff] }
  0xa4   :  { %320 = vmatprep.mubr.f32.mxu0 %v999_v0 }
  0xa7   :  { %724 = vmatmul.mubr.msk.f32.gmra.mrb[10].mxu0 %vm73_vm0, %v245_v21  ;;  %v553_v21 = vld [vmem:[%s1278_s6 + $0x18] sm:$0xff] }
  0xa8   :  { %640 = vmatprep.mubr.f32.mxu0 %v999_v0  ;;  %v866_v22 = vpack.c.bf16 %v553_v21, %v551_v20 }
  0xaa   :  { %867 = vmatprep.subr.bf16.mxu0 %v866_v22 }
  0xab   :  { %869 = vmatpush1.bf16.msra.mxu0 %v868_v25 }
  0xac   :  { %871 = vmatprep.subr.bf16.mxu0 %v870_v28 }
  0xaf   :  { %873 = vmatpush1.bf16.msra.mxu0 %v872_v31 }
 0x107   :  { %v146_v43 = vpop.f32.mrb[0].mxu0 }
 0x108   :  { %v1171_v44 = vpop.f32.mrb[1].mxu0  ;;  %v327_v51 = vmul.f32 %v146_v43, %v146_v43 }
 0x10b   :  { %v152_v47 = vpop.f32.mrb[2].mxu0 }
 0x10c   :  { %v1179_v49 = vpop.f32.mrb[3].mxu0  ;;  %v328_v56 = vmul.f32 %v152_v47, %v152_v47 }
 0x16e   :  { %v231_v50 = vpop.f32.mrb[4].mxu0 }
 0x16f   :  { %v329_v52 = vmul.f32 %v231_v50, %v231_v50  ;;  %v1181_v53 = vpop.f32.mrb[5].mxu0 }
 0x171   :  { %v331_v54 = vadd.f32 %v329_v52, %v327_v51  ;;  %v558_v52 = vld [vmem:[%s1279_s7] sm:$0x3]  ;;  %s1003_s7 = smov 16  }
 0x172   :  { %v237_v55 = vpop.f32.mrb[6].mxu0 }
 0x173   :  { %v330_v57 = vmul.f32 %v237_v55, %v237_v55  ;;  %v1183_v58 = vpop.f32.mrb[7].mxu0 }
 0x175   :  { %v332_v59 = vadd.f32 %v330_v57, %v328_v56 }
 0x176   :  { %v316_v60 = vpop.f32.mrb[8].mxu0 }
 0x177   :  { %v333_v61 = vmul.f32 %v316_v60, %v316_v60  ;;  %v1185_v62 = vpop.f32.mrb[9].mxu0 }
 0x179   :  { %v335_v63 = vadd.f32 %v333_v61, %v331_v54 }
 0x17a   :  { %v322_v1 = vpop.f32.mrb[10].mxu0 }
 0x17b   :  { %v334_v2 = vmul.f32 %v322_v1, %v322_v1  ;;  %v1187_v3 = vpop.f32.mrb[11].mxu0  ;;  %887 = vrsqrt.f32 %v335_v63  ;;  %vm339_vm1 = vcmp.eq.f32.partialorder %v335_v63, inf  ;;  %v342_v7 = vand.u32 2147483648, %v335_v63 }
 0x17c   :  { %vm341_vm2 = vcmp.eq.f32.partialorder %v335_v63, 0.0 }
 0x17d   :  { %v336_v4 = vadd.f32 %v334_v2, %v332_v59 }
 0x17f   :  { %889 = vrsqrt.f32 %v336_v4  ;;  %vm346_vm3 = vcmp.eq.f32.partialorder %v336_v4, inf  ;;  %v349_v14 = vand.u32 2147483648, %v336_v4  ;;  %vm348_vm4 = vcmp.eq.f32.partialorder %v336_v4, 0.0 }
 0x185   :  { %v888_v5 = vpop.eup %887 }
 0x186   :  { %v338_v6 = vmul.f32 %v888_v5, %v335_v63 }
 0x188   :  { %v340_v8 = vsel %vm339_vm1, %v335_v63, %v338_v6 }
 0x189   :  { %v890_v9 = vpop.eup %889  ;;  %v343_v10 = vsel %vm341_vm2, %v342_v7, %v340_v8 }
 0x18a   :  { %788 = vmatprep.mubr.f32.mxu1 %v343_v10  ;;  %v345_v13 = vmul.f32 %v890_v9, %v336_v4 }
 0x18c   :  { %v347_v15 = vsel %vm346_vm3, %v336_v4, %v345_v13 }
 0x18d   :  { %v350_v18 = vsel %vm348_vm4, %v349_v14, %v347_v15 }
 0x18e   :  { %789 = vmatmul.mubr.f32.vlgmr.msra.gmra.mrb[0].mxu1 %v350_v18 }
 0x18f   :  { %861 = vmatpush3.bf16.msra.mxu1 %v858_v48  ;;  %799 = vmatprep.mubr.msk.f32.mxu1 %vm73_vm0, %v61_v17  ;;  %v560_v48 = vlaneseq }
 0x190   :  { %863 = vmatprep.subr.bf16.mxu1 %v862_v16 }
 0x191   :  { %v561_v50 = vshrl.u32 %v560_v48, 7 }
 0x193   :  { %865 = vmatpush3.bf16.msra.mxu1 %v862_v16  ;;  %v562_v51 = vsub.s32 0, %v561_v50  ;;  %v566_v54 = vsub.s32 1, %v561_v50 }
 0x195   :  { %v563_v55 = vrot.slane %v558_v52, %v562_v51  ;;  %v567_v56 = vrot.slane %v558_v52, %v566_v54 }
 0x196   :  { %800 = vmatmul.mubr.msk.f32.vlgmr.msra.gmra.mrb[0].mxu1 %vm73_vm0, %v62_v19 }
 0x269   :  { %v801_v33 = vpop.f32.mrb[0].mxu1 }
 0x26a   :  { %v535_v34 = vadd.f32 %v801_v33, %v727_v32  ;;  %v518_v35 = vpop.f32.mrb[1].mxu1 }
 0x26b   :  { %v534_v36 = vadd.f32 %v727_v32, %v518_v35 }
 0x26c   :  { %v729_v37 = vmul.f32 -1.442695, %v535_v34 }
 0x26d   :  { %v728_v38 = vmul.f32 -1.442695, %v534_v36 }
 0x26e   :  { %891 = vpow2.f32 %v729_v37 }
 0x26f   :  { %893 = vpow2.f32 %v728_v38 }
 0x278   :  { %v892_v39 = vpop.eup %891 }
 0x279   :  { %v894_v40 = vpop.eup %893  ;;  %v543_v41 = vadd.f32 1.0, %v892_v39 }
 0x27a   :  { %v542_v42 = vadd.f32 1.0, %v894_v40 }
 0x27c   :  { %895 = vrcp.f32 %v542_v42 }
 0x27d   :  { %897 = vrcp.f32 %v543_v41 }
 0x286   :  { %v896_v43 = vpop.eup %895 }
 0x287   :  { %v548_v45 = vmul.f32 %v896_v43, %v534_v36  ;;  %v898_v46 = vpop.eup %897 }
 0x288   :  { %v549_v47 = vmul.f32 %v898_v46, %v535_v34 }
 0x289   :  { %730 = vmatmul.mubr.msk.f32.vlgmr.msra.gmra.mrb[12].mxu0 %vm73_vm0, %v548_v45 }
 0x28a   :  { %646 = vmatprep.mubr.f32.mxu0 %v999_v0 }
 0x28d   :  { %731 = vmatmul.mubr.msk.f32.gmra.mrb[14].mxu0 %vm73_vm0, %v549_v47 }
 0x35c   :  { %v642_v57 = vpop.f32.mrb[12].mxu0 }
 0x35d   :  { %v643_v59 = vadd.f32 %v642_v57, %v563_v55  ;;  %v644_v60 = vpop.f32.mrb[13].mxu0 }
 0x35e   :  { %v645_v61 = vadd.f32 %v644_v60, %v567_v56 }
 0x35f   :  { %654 = vst.msk [vmem:[#allocation7] sm:$0xff] %vm653_vm5, %v643_v59 }
 0x360   :  { %v656_v0 = vmul.f32 %v645_v61, %v1171_v44  ;;  %v648_v63 = vpop.f32.mrb[14].mxu0  ;;  %v658_v1 = vmul.f32 %v645_v61, %v1181_v53  ;;  %v660_v2 = vmul.f32 %v645_v61, %v1185_v62 }
 0x361   :  { %v649_v4 = vadd.f32 %v648_v63, %v563_v55  ;;  %v650_v5 = vpop.f32.mrb[15].mxu0 }
 0x362   :  { %v651_v6 = vadd.f32 %v650_v5, %v567_v56  ;;  %664 = vrot.lane.b32.xlu0 %v658_v1, %s1003_s7 }
 0x363   :  { %655 = vst.msk [vmem:[#allocation7 + $0x8] sm:$0xff] %vm653_vm5, %v649_v4 }
 0x364   :  { %v657_v7 = vmul.f32 %v651_v6, %v1179_v49  ;;  %v659_v8 = vmul.f32 %v651_v6, %v1183_v58  ;;  %v661_v9 = vmul.f32 %v651_v6, %v1187_v3 }
 0x365   :  { %954 = shalt.err (!%p951_p6)
}
 0x366   :  { %s955_s26 = scalar_lea.hbm %s1280_s8, 256 }
 0x367   :  { %p956_p7 = scmp.ne.s32.totalorder %s1280_s8, %s955_s26  ;;  %p959_p8 = scmp.lt.u32.totalorder %s955_s26, %s1280_s8 }
 0x369   :  { %p961_p9 = pnand %p959_p8, %p956_p7 }
 0x36b   :  { %964 = shalt.err (!%p961_p9)
}
 0x36c   :  { %696 = dma.vmem_to_hbm [thread:$0]  %s691_s23, 256, %s1280_s8, [#allocation4], %s996_s19, %s996_s19, %s997_s20   ;;  %vm682_vm6 = vcmask 392192  }
 0x36d   :  { %666 = vrot.lane.b32.xlu1 %v659_v8, %s1003_s7  ;;  %s1004_s2 = smov 32   ;;  %s1005_s12 = smov [#allocation8]  }
 0x36e   :  { %672 = vrot.lane.b32.xlu0 %v660_v2, %s1004_s2  ;;  %s702_s0 = sshll.u32 %s1005_s12, 4  ;;  %s703_s0 = int_to_ptr.vmem [resolvable:$true] %s702_s0 }
 0x36f   :  { %s965_s8 = scalar_lea.vmem %s703_s0, 256  ;;  %p970_p11 = scmp.lt.s32.totalorder %s703_s0, %s703_s0 }
 0x370   :  { %p966_p10 = scmp.ne.s32.totalorder %s703_s0, %s965_s8  ;;  %p971_p12 = scmp.lt.s32.totalorder %s965_s8, %s965_s8 }
 0x371   :  { %674 = vrot.lane.b32.xlu1 %v661_v9, %s1004_s2 }
 0x372   :  { %p972_p13 = por %p971_p12, %p970_p11 }
 0x374   :  { %p973_p0 = pnand %p972_p13, %p966_p10 }
 0x3d4   :  { %v665_v44 = vpop.permute.xlu0 %664 }
 0x3d5   :  { %v678_v49 = vsel %vm653_vm5, %v656_v0, %v665_v44 }
 0x3df   :  { %v667_v53 = vpop.permute.xlu1 %666 }
 0x3e0   :  { %v673_v58 = vpop.permute.xlu0 %672  ;;  %v679_v3 = vsel %vm653_vm5, %v657_v7, %v667_v53 }
 0x3e1   :  { %v680_v62 = vsel %vm73_vm0, %v678_v49, %v673_v58 }
 0x3e2   :  { %683 = vst.msk [vmem:[#allocation8] sm:$0xff] %vm682_vm6, %v680_v62 }
 0x3e3   :  { %v675_v10 = vpop.permute.xlu1 %674 }
 0x3e4   :  { %v681_v11 = vsel %vm73_vm0, %v679_v3, %v675_v10 }
 0x3e5   :  { %684 = vst.msk [vmem:[#allocation8 + $0x8] sm:$0xff] %vm682_vm6, %v681_v11 }
 0x3e6   :  { %976 = shalt.err (!%p973_p0)
}
 0x3e7   :  { %s977_s14 = scalar_lea.hbm %s1281_s9, 256 }
 0x3e8   :  { %p978_p1 = scmp.ne.s32.totalorder %s1281_s9, %s977_s14  ;;  %p981_p2 = scmp.lt.u32.totalorder %s977_s14, %s1281_s9 }
 0x3ea   :  { %p983_p3 = pnand %p981_p2, %p978_p1 }
 0x3ec   :  { %986 = shalt.err (!%p983_p3)
}
 0x3ed   :  { %708 = dma.vmem_to_hbm [thread:$0]  %s703_s0, 256, %s1281_s9, [#allocation9], %s996_s19, %s996_s19, %s997_s20  }
 0x3ee   :  { %991 = dma.done.wait [#allocation4], 256  }
 0x3ef   :  { %992 = vsyncadd [#allocation4], 4294967040 }
 0x3f0   :  { %993 = dma.done.wait [#allocation9], 256  }
 0x3f1   :  { %994 = vsyncadd [#allocation9], 4294967040 }
 0x3f2   :  { %715 = vsyncpa [#allocation3], 1 }
 0x3f3   :  { %716 = vsyncpa [#allocation6], 1 }
 0x3f4   :  { %717 = vsyncpa [#allocation4], 1 }
 0x3f5   :  { %718 = vsyncpa [#allocation9], 1 }

</bundles_post_ra>
